<compile_context>
chip_gen: v7x
topology: tpu7x:2x2x1
jax: 0.10.0
libtpu: 0.0.40
codegen_flags: <defaults>
</compile_context>

<pallas_src>
import functools

import jax
import jax.numpy as jnp
from jax.experimental import pallas as pl
from jax.experimental.pallas import tpu as pltpu

_LANES = 128
_SUBLANES = 8
_GROUP = _SUBLANES * _LANES        # 1024 elements per (8, 128) vreg tile
_MAX_BLOCK_K = 512                 # 512 * 1024 elems = 2 MiB f32 per input block


def _rmse_kernel(yh_ref, y_ref, out_ref, acc_ref, *,
                 k_total, block_k, n_elems, eps):
    i = pl.program_id(0)

    @pl.when(i == 0)
    def _():
        acc_ref[...] = jnp.zeros_like(acc_ref)

    d = yh_ref[...].astype(jnp.float32) - y_ref[...].astype(jnp.float32)
    sq = d * d

    # Only needed when block_k does not evenly divide the group count: the
    # final block reads past the (already zero-padded) slab, and those
    # undefined groups must not contribute.
    if k_total % block_k != 0:
        g = jax.lax.broadcasted_iota(jnp.int32, sq.shape, 0) + i * block_k
        sq = jnp.where(g < k_total, sq, jnp.float32(0.0))

    # Leading-axis reduce = chain of vreg adds (VALU only, no XLU); keeps the
    # persistent accumulator at a single (8, 128) tile.
    acc_ref[...] += jnp.sum(sq, axis=0)

    @pl.when(i == pl.num_programs(0) - 1)
    def _():
        total = jnp.sum(acc_ref[...])   # single cross-lane reduce at the end.
        out_ref[0, 0] = jnp.sqrt(total / jnp.float32(n_elems) + jnp.float32(eps))


def rmse_loss(y_hat, y, eps=1e-6):
    assert y_hat.shape == y.shape, "y_hat and y must have the same shape"
    n_elems = int(y_hat.size)

    # Flatten in native dtype (free for contiguous arrays).
    yh = jnp.ravel(y_hat)
    yt = jnp.ravel(y)

    # Zero-pad only the tail (< 1024 elements) so the slab is a whole number
    # of (8, 128) tiles; the padded zeros contribute 0 to the squared-diff sum.
    pad = (-n_elems) % _GROUP
    if pad:
        yh = jnp.pad(yh, (0, pad))
        yt = jnp.pad(yt, (0, pad))
    k_total = (n_elems + pad) // _GROUP
    yh3 = yh.reshape(k_total, _SUBLANES, _LANES)
    yt3 = yt.reshape(k_total, _SUBLANES, _LANES)

    # Largest block that fits comfortably in VMEM; full extent if small.
    block_k = k_total if k_total <= _MAX_BLOCK_K else _MAX_BLOCK_K
    grid = (pl.cdiv(k_total, block_k),)

    bytes_accessed = n_elems * (jnp.dtype(y_hat.dtype).itemsize
                                + jnp.dtype(y.dtype).itemsize) + 4

    out = pl.pallas_call(
        functools.partial(
            _rmse_kernel,
            k_total=k_total,
            block_k=block_k,
            n_elems=n_elems,
            eps=eps,
        ),
        out_shape=jax.ShapeDtypeStruct((1, 1), jnp.float32),
        grid_spec=pltpu.PrefetchScalarGridSpec(
            num_scalar_prefetch=0,
            grid=grid,
            in_specs=[
                pl.BlockSpec((block_k, _SUBLANES, _LANES), lambda i: (i, 0, 0)),
                pl.BlockSpec((block_k, _SUBLANES, _LANES), lambda i: (i, 0, 0)),
            ],
            out_specs=pl.BlockSpec(
                (1, 1), lambda i: (0, 0), memory_space=pltpu.SMEM
            ),
            scratch_shapes=[pltpu.VMEM((_SUBLANES, _LANES), jnp.float32)],
        ),
        compiler_params=pltpu.CompilerParams(
            dimension_semantics=("arbitrary",),
            vmem_limit_bytes=32 * 1024 * 1024,
        ),
        cost_estimate=pl.CostEstimate(
            flops=3 * n_elems,
            transcendentals=0,
            bytes_accessed=bytes_accessed,
        ),
    )(yh3, yt3)

    return out[0, 0]


if __name__ == "__main__":
    key = jax.random.PRNGKey(0)
    k1, k2 = jax.random.split(key)

    # Small NCHW-like prediction/target pair (single grid step, no padding).
    shape = (2, 4, 16, 16)
    y_hat = jax.random.normal(k1, shape, dtype=jnp.float32)
    y = jax.random.normal(k2, shape, dtype=jnp.float32)
    loss = jax.block_until_ready(rmse_loss(y_hat, y))
    ref = jnp.sqrt(jnp.mean((y_hat - y) ** 2) + 1e-6)
    assert jnp.allclose(loss, ref, rtol=1e-5, atol=1e-6), (loss, ref)

    # Non-multiple-of-1024 size (exercises the tail-pad path).
    shape2 = (3, 5, 17, 13)
    a = jax.random.normal(k1, shape2, dtype=jnp.float32)
    b = jax.random.normal(k2, shape2, dtype=jnp.float32)
    loss2 = jax.block_until_ready(rmse_loss(a, b))
    ref2 = jnp.sqrt(jnp.mean((a - b) ** 2) + 1e-6)
    assert jnp.allclose(loss2, ref2, rtol=1e-5, atol=1e-6), (loss2, ref2)

    # Larger ragged size (exercises multi-step grid + partial-block masking).
    shape3 = (1, 5, 321, 417)
    c = jax.random.normal(k1, shape3, dtype=jnp.float32)
    d = jax.random.normal(k2, shape3, dtype=jnp.float32)
    loss3 = jax.block_until_ready(rmse_loss(c, d))
    ref3 = jnp.sqrt(jnp.mean((c - d) ** 2) + 1e-6)
    assert jnp.allclose(loss3, ref3, rtol=1e-5, atol=1e-6), (loss3, ref3)

    print("KERNEL_OK")
</pallas_src>

<mosaic_0001>
module attributes {stable_mosaic.version = 11 : i64} {
  func.func @_rmse_kernel(%arg0: i32, %arg1: memref<2x8x128xf32, #tpu.memory_space<vmem>>, %arg2: memref<2x8x128xf32, #tpu.memory_space<vmem>>, %arg3: memref<1x1xf32, #tpu.memory_space<smem>>, %arg4: memref<8x128xf32, #tpu.memory_space<vmem>>) attributes {dimension_semantics = [#tpu.dimension_semantics<arbitrary>], iteration_bounds = array<i64: 1>, scalar_prefetch = 0 : i64, scratch_operands = 1 : i64, tpu.core_type = #tpu.core_type<tc>, window_params = [{transform_indices = @transform_0, window_bounds = array<i64: 2, 8, 128>}, {transform_indices = @transform_1, window_bounds = array<i64: 2, 8, 128>}, {transform_indices = @transform_2, window_bounds = array<i64: 1, 1>}]} {
    %c0_i32 = arith.constant 0 : i32
    %0 = arith.cmpi eq, %arg0, %c0_i32 : i32
    %1 = arith.extui %0 : i1 to i32
    %c0_i32_0 = arith.constant 0 : i32
    %2 = arith.cmpi ne, %1, %c0_i32_0 : i32
    scf.if %2 {
      %cst_12 = arith.constant 0.000000e+00 : f32
      %14 = vector.broadcast %cst_12 : f32 to vector<8x128xf32>
      %c0_13 = arith.constant 0 : index
      %c0_14 = arith.constant 0 : index
      %15 = vector.load %arg4[%c0_13, %c0_14] : memref<8x128xf32, #tpu.memory_space<vmem>>, vector<8x128xf32>
      tpu.vector_store %arg4[%c0_13, %c0_14], %14 {strides = array<i32>} : memref<8x128xf32, #tpu.memory_space<vmem>>, vector<8x128xf32>,
    } else {
    }
    %c0 = arith.constant 0 : index
    %c0_1 = arith.constant 0 : index
    %c0_2 = arith.constant 0 : index
    %3 = vector.load %arg1[%c0, %c0_1, %c0_2] : memref<2x8x128xf32, #tpu.memory_space<vmem>>, vector<2x8x128xf32>
    %c0_3 = arith.constant 0 : index
    %c0_4 = arith.constant 0 : index
    %c0_5 = arith.constant 0 : index
    %4 = vector.load %arg2[%c0_3, %c0_4, %c0_5] : memref<2x8x128xf32, #tpu.memory_space<vmem>>, vector<2x8x128xf32>
    %5 = arith.subf %3, %4 : vector<2x8x128xf32>
    %6 = arith.mulf %5, %5 : vector<2x8x128xf32>
    %c0_6 = arith.constant 0 : index
    %c0_7 = arith.constant 0 : index
    %7 = vector.load %arg4[%c0_6, %c0_7] : memref<8x128xf32, #tpu.memory_space<vmem>>, vector<8x128xf32>
    %cst = arith.constant dense<0.000000e+00> : vector<8x128xf32>
    %8 = vector.multi_reduction <add>, %6, %cst [0] : vector<2x8x128xf32> to vector<8x128xf32>
    %9 = arith.addf %7, %8 : vector<8x128xf32>
    %c0_8 = arith.constant 0 : index
    %c0_9 = arith.constant 0 : index
    %10 = vector.load %arg4[%c0_8, %c0_9] : memref<8x128xf32, #tpu.memory_space<vmem>>, vector<8x128xf32>
    tpu.vector_store %arg4[%c0_8, %c0_9], %9 {strides = array<i32>} : memref<8x128xf32, #tpu.memory_space<vmem>>, vector<8x128xf32>,
    %c0_i32_10 = arith.constant 0 : i32
    %11 = arith.cmpi eq, %arg0, %c0_i32_10 : i32
    %12 = arith.extui %11 : i1 to i32
    %c0_i32_11 = arith.constant 0 : i32
    %13 = arith.cmpi ne, %12, %c0_i32_11 : i32
    scf.if %13 {
      %c0_12 = arith.constant 0 : index
      %c0_13 = arith.constant 0 : index
      %14 = vector.load %arg4[%c0_12, %c0_13] : memref<8x128xf32, #tpu.memory_space<vmem>>, vector<8x128xf32>
      %15 = vector.shape_cast %14 : vector<8x128xf32> to vector<1x8x128xf32>
      %cst_14 = arith.constant dense<0.000000e+00> : vector<1xf32>
      %16 = vector.multi_reduction <add>, %15, %cst_14 [1, 2] : vector<1x8x128xf32> to vector<1xf32>
      %17 = vector.shape_cast %16 : vector<1xf32> to vector<1x1x1xf32>
      %18 = vector.extract %17[0, 0, 0] : f32 from vector<1x1x1xf32>
      %cst_15 = arith.constant 2.048000e+03 : f32
      %19 = arith.divf %18, %cst_15 : f32
      %cst_16 = arith.constant 9.99999997E-7 : f32
      %20 = arith.addf %19, %cst_16 : f32
      %21 = math.sqrt %20 : f32
      %c0_17 = arith.constant 0 : index
      %c0_18 = arith.constant 0 : index
      %22 = memref.load %arg3[%c0_17, %c0_18] : memref<1x1xf32, #tpu.memory_space<smem>>
      memref.store %21, %arg3[%c0_17, %c0_18] : memref<1x1xf32, #tpu.memory_space<smem>>
    } else {
    }
    return
  }
  func.func @transform_0(%arg0: i32) -> (i32, i32, i32) {
    %c0_i32 = arith.constant 0 : i32
    %c0_i32_0 = arith.constant 0 : i32
    %c0_i32_1 = arith.constant 0 : i32
    return %arg0, %c0_i32, %c0_i32_0 : i32, i32, i32
  }
  func.func @transform_1(%arg0: i32) -> (i32, i32, i32) {
    %c0_i32 = arith.constant 0 : i32
    %c0_i32_0 = arith.constant 0 : i32
    %c0_i32_1 = arith.constant 0 : i32
    return %arg0, %c0_i32, %c0_i32_0 : i32, i32, i32
  }
  func.func @transform_2(%arg0: i32) -> (i32, i32) {
    %c0_i32 = arith.constant 0 : i32
    %c0_i32_0 = arith.constant 0 : i32
    %c0_i32_1 = arith.constant 0 : i32
    return %c0_i32, %c0_i32_0 : i32, i32
  }
}

</mosaic_0001>

<bundles_post_ra>
// kernel: tpu_custom_call.1
= control target key start
LH: loop header
LB: loop body
LE: loop exit
PB: predicated region body
PF: predicated region fallthrough
CT: control target
= control target key end

     0   :  { %7 = vsyncpa [#allocation4], 0  ;;  %s227_s0 = inlined_call_operand.hbm [shape: f32[2,8,128], index: 0, kind: input, shape index: {}]   ;;  %s228_s1 = inlined_call_operand.hbm [shape: f32[2,8,128], index: 1, kind: input, shape index: {}]   ;;  %s229_s2 = inlined_call_operand.hbm [shape: f32[1,1], index: 2, kind: output, shape index: {}]  }
   0x1   :  { %8 = vsyncpa [#allocation7], 0 }
   0x2   :  { %9 = vsyncpa [#allocation5], 0  ;;  %s171_s9 = smov [#allocation3]   ;;  %s111_s13 = scalar_lea.hbm %s227_s0, 256 }
   0x3   :  { %s15_s10 = sshll.u32 %s171_s9, 4  ;;  %p112_p0 = scmp.ne.s32.totalorder %s227_s0, %s111_s13  ;;  %s16_s10 = int_to_ptr.vmem [resolvable:$true] %s15_s10 }
   0x4   :  { %p115_p1 = scmp.lt.u32.totalorder %s111_s13, %s227_s0 }
   0x6   :  { %p117_p2 = pnand %p115_p1, %p112_p0 }
   0x8   :  { %120 = shalt.err (!%p117_p2)
}
   0x9   :  { %s121_s18 = scalar_lea.vmem %s16_s10, 256  ;;  %p126_p4 = scmp.lt.s32.totalorder %s16_s10, %s16_s10 }
   0xa   :  { %p122_p3 = scmp.ne.s32.totalorder %s16_s10, %s121_s18  ;;  %p127_p5 = scmp.lt.s32.totalorder %s121_s18, %s121_s18 }
   0xc   :  { %p128_p6 = por %p127_p5, %p126_p4 }
   0xe   :  { %p129_p7 = pnand %p128_p6, %p122_p3 }
  0x10   :  { %132 = shalt.err (!%p129_p7)
}
  0x11   :  { %s172_s19 = smov 128   ;;  %s173_s20 = smov 8  }
  0x12   :  { %21 = dma.hbm_to_vmem [thread:$0]  %s227_s0, 256, %s16_s10, [#allocation4], %s172_s19, %s172_s19, %s173_s20  }
  0x13   :  { %s174_s23 = smov [#allocation6]   ;;  %s133_s27 = scalar_lea.hbm %s228_s1, 256 }
  0x14   :  { %s27_s24 = sshll.u32 %s174_s23, 4  ;;  %p134_p8 = scmp.ne.s32.totalorder %s228_s1, %s133_s27  ;;  %s28_s24 = int_to_ptr.vmem [resolvable:$true] %s27_s24 }
  0x15   :  { %p137_p9 = scmp.lt.u32.totalorder %s133_s27, %s228_s1 }
  0x17   :  { %p139_p10 = pnand %p137_p9, %p134_p8 }
  0x19   :  { %142 = shalt.err (!%p139_p10)
}
  0x1a   :  { %s143_s4 = scalar_lea.vmem %s28_s24, 256  ;;  %p148_p12 = scmp.lt.s32.totalorder %s28_s24, %s28_s24 }
  0x1b   :  { %p144_p11 = scmp.ne.s32.totalorder %s28_s24, %s143_s4  ;;  %p149_p13 = scmp.lt.s32.totalorder %s143_s4, %s143_s4 }
  0x1d   :  { %p150_p0 = por %p149_p13, %p148_p12 }
  0x1f   :  { %p151_p1 = pnand %p150_p0, %p144_p11 }
  0x21   :  { %154 = shalt.err (!%p151_p1)
}
  0x22   :  { %33 = dma.hbm_to_vmem [thread:$0]  %s228_s1, 256, %s28_s24, [#allocation7], %s172_s19, %s172_s19, %s173_s20  }
  0x23   :  { %165 = dma.done.wait [#allocation4], 256  }
  0x24   :  { %166 = vsyncadd [#allocation4], 4294967040 }
  0x25   :  { %167 = dma.done.wait [#allocation7], 256  }
  0x26   :  { %168 = vsyncadd [#allocation7], 4294967040  ;;  %v45_v0 = vld [vmem:[#allocation3] sm:$0xff]  ;;  %v46_v1 = vld [vmem:[#allocation3 + $0x8] sm:$0xff]  ;;  %s155_s11 = scalar_lea.hbm %s229_s2, 16 }
  0x27   :  { %v47_v2 = vld [vmem:[#allocation6] sm:$0xff]  ;;  %v48_v3 = vld [vmem:[#allocation6 + $0x8] sm:$0xff]  ;;  %p156_p2 = scmp.ne.s32.totalorder %s229_s2, %s155_s11  ;;  %p159_p3 = scmp.lt.u32.totalorder %s155_s11, %s229_s2 }
  0x28   :  { %v49_v4 = vsub.f32 %v45_v0, %v47_v2  ;;  %v50_v5 = vsub.f32 %v46_v1, %v48_v3 }
  0x29   :  { %p161_p4 = pnand %p159_p3, %p156_p2 }
  0x2a   :  { %v51_v6 = vmul.f32 %v49_v4, %v49_v4  ;;  %v52_v7 = vmul.f32 %v50_v5, %v50_v5 }
  0x2c   :  { %v54_v8 = vadd.f32 %v52_v7, %v51_v6 }
  0x2e   :  { %61 = vadd.xlane.f32.xlu0 %v54_v8 }
  0xbb   :  { %v62_v9 = vpop.xlane.xlu0 %61 }
  0xbc   :  { %v63_v10 = vrot.slane %v62_v9, 4 }
  0xbe   :  { %v64_v11 = vadd.f32 %v63_v10, %v62_v9 }
  0xc0   :  { %v65_v12 = vrot.slane %v64_v11, 2 }
  0xc2   :  { %v66_v13 = vadd.f32 %v65_v12, %v64_v11 }
  0xc4   :  { %v67_v14 = vrot.slane %v66_v13, 1 }
  0xc6   :  { %v68_v15 = vadd.f32 %v67_v14, %v66_v13 }
  0xc8   :  { %100 = vpush %v68_v15 }
  0xf9   :  { %s101_s1 = spop %100 }
  0xfa   :  { %s72_s6 = smul.f32 0.00048828125, %s101_s1 }
  0xfc   :  { %s73_s7 = sadd.f32 1e-06, %s72_s6 }
  0xfe   :  { %v74_v16 = vstv %s73_s7 }
  0xff   :  { %109 = vrsqrt.f32 %v74_v16  ;;  %vm77_vm0 = vcmp.eq.f32.partialorder %v74_v16, inf  ;;  %v80_v19 = vand.u32 2147483648, %v74_v16  ;;  %vm79_vm1 = vcmp.eq.f32.partialorder %v74_v16, 0.0 }
 0x109   :  { %v110_v17 = vpop.eup %109 }
 0x10a   :  { %v76_v18 = vmul.f32 %v110_v17, %v74_v16 }
 0x10c   :  { %v78_v20 = vsel %vm77_vm0, %v74_v16, %v76_v18 }
 0x10d   :  { %v81_v21 = vsel %vm79_vm1, %v80_v19, %v78_v20 }
 0x10e   :  { %102 = vpush %v81_v21 }
 0x13f   :  { %s103_s8 = spop %102 }
 0x140   :  { %84 = sst [smem:[#allocation8]] %s103_s8 }
 0x141   :  { %164 = shalt.err (!%p161_p4)
}
 0x142   :  { %s175_s16 = smov [#allocation8]  }
 0x143   :  { %92 = dma.smem_to_hbm %s175_s16, 16, %s229_s2, [#allocation5]  }
 0x144   :  { %169 = dma.done.wait [#allocation5], 16  }
 0x145   :  { %170 = vsyncadd [#allocation5], 4294967280 }
 0x146   :  { %96 = sfence }
 0x147   :  { %97 = vsyncpa [#allocation4], 1 }
 0x148   :  { %98 = vsyncpa [#allocation7], 1 }
 0x149   :  { %99 = vsyncpa [#allocation5], 1 }

</bundles_post_ra>
